<compile_context>
chip_gen: v5e
topology: v5e:2x2
jax: 0.10.0
libtpu: 0.0.40
codegen_flags: <defaults>
</compile_context>

<pallas_src>
import functools

import jax
import jax.numpy as jnp
from jax.experimental import pallas as pl
from jax.experimental.pallas import tpu as pltpu

LANE = 128     # lane width (last dim)
SUBLANE = 8    # f32 sublane height (second-to-last dim)


def _round_up(x: int, m: int) -> int:
    return (x + m - 1) // m * m


def mlp_kernel(x_ref, w1_ref, b1_ref, w2_ref, b2_ref, w3_ref, b3_ref, o_ref):
    # x arrives unpadded f32; cast to bf16 in-kernel (no wrapper-side pad/cast HBM pass).
    x = x_ref[...].astype(jnp.bfloat16)
    # Layer 1: Linear (bf16 x bf16 -> f32 acc) + bias + ReLU (f32).  Dropout == identity (eval).
    h = jnp.dot(x, w1_ref[...], preferred_element_type=jnp.float32)
    h = jnp.maximum(h + b1_ref[...], 0.0)
    # Layer 2: Linear + bias + ReLU
    h = jnp.dot(h.astype(jnp.bfloat16), w2_ref[...], preferred_element_type=jnp.float32)
    h = jnp.maximum(h + b2_ref[...], 0.0)
    # Output layer: Linear + bias (no activation), stored at its true 16-lane width.
    out = jnp.dot(h.astype(jnp.bfloat16), w3_ref[...], preferred_element_type=jnp.float32)
    o_ref[...] = (out + b3_ref[...]).astype(o_ref.dtype)


def _pad_params(params):
    """Pad only the hidden out-dims to 128 lanes; keep W1's K dim and W3's N dim exact.

    Weights -> bf16 (MXU-native), biases stay f32.  Zero padding is numerically exact
    for Linear + ReLU (padded columns stay identically zero through the network).
    """
    (w1, b1), (w2, b2), (w3, b3) = params
    h1, h2 = w1.shape[1], w2.shape[1]
    h1_p, h2_p = _round_up(h1, LANE), _round_up(h2, LANE)

    w1_p = jnp.pad(w1, ((0, 0), (0, h1_p - h1))).astype(jnp.bfloat16)           # (in, 128)
    b1_p = jnp.pad(b1, ((0, 0), (0, h1_p - h1))).astype(jnp.float32)            # (1, 128)
    w2_p = jnp.pad(w2, ((0, h1_p - h1), (0, h2_p - h2))).astype(jnp.bfloat16)   # (128, 128)
    b2_p = jnp.pad(b2, ((0, 0), (0, h2_p - h2))).astype(jnp.float32)            # (1, 128)
    w3_p = jnp.pad(w3, ((0, h2_p - h2), (0, 0))).astype(jnp.bfloat16)           # (128, out)
    b3_p = b3.astype(jnp.float32)                                               # (1, out)
    return (w1_p, b1_p), (w2_p, b2_p), (w3_p, b3_p)


@functools.partial(jax.jit, static_argnames=("batch_tile",))
def agent_model_forward(x, params, *, batch_tile=2048):
    """params = [(W1, b1), (W2, b2), (W3, b3)] with W_i of shape (in, out), b_i of shape (1, out)."""
    (w1, b1), (w2, b2), (w3, b3) = _pad_params(params)

    batch, in_size = x.shape
    out_size = w3.shape[1]
    h1_p, h2_p = w1.shape[1], w2.shape[1]

    # Balanced batch tiling:
    #   * big default tile (2048) to amortize the ~0.35us per-grid-step overhead,
    #   * tb derived from cdiv so batch padding stays <= 7 rows,
    #   * >= 2 (even) grid steps whenever batch > 8 so v7x's two TensorCores both get work.
    num_steps = pl.cdiv(batch, batch_tile)
    if batch > SUBLANE:
        num_steps = max(num_steps, 2)
        if num_steps % 2:
            num_steps += 1
    tb = _round_up(pl.cdiv(batch, num_steps), SUBLANE)
    grid_steps = pl.cdiv(batch, tb)
    batch_p = tb * grid_steps

    # Only small row padding (< tb rows); no lane padding and no dtype cast of x here.
    x_in = x if batch_p == batch else jnp.pad(x, ((0, batch_p - batch), (0, 0)))

    flops = 2 * batch_p * (in_size * h1_p + h1_p * h2_p + h2_p * out_size)
    bytes_accessed = (
        batch_p * in_size * 4                                # f32 activations in (unpadded)
        + (w1.size + w2.size + w3.size) * 2                  # bf16 resident weights
        + (b1.size + b2.size + b3.size) * 4                  # f32 biases
        + batch_p * out_size * 4                             # f32 output (true width)
    )

    out_padded = pl.pallas_call(
        mlp_kernel,
        out_shape=jax.ShapeDtypeStruct((batch_p, out_size), jnp.float32),
        grid_spec=pltpu.PrefetchScalarGridSpec(
            num_scalar_prefetch=0,
            grid=(grid_steps,),
            in_specs=[
                pl.BlockSpec((tb, in_size), lambda i: (i, 0)),    # x tile, streamed/pipelined
                pl.BlockSpec(w1.shape, lambda i: (0, 0)),         # W1 resident
                pl.BlockSpec(b1.shape, lambda i: (0, 0)),         # b1 resident
                pl.BlockSpec(w2.shape, lambda i: (0, 0)),         # W2 resident
                pl.BlockSpec(b2.shape, lambda i: (0, 0)),         # b2 resident
                pl.BlockSpec(w3.shape, lambda i: (0, 0)),         # W3 resident
                pl.BlockSpec(b3.shape, lambda i: (0, 0)),         # b3 resident
            ],
            out_specs=pl.BlockSpec((tb, out_size), lambda i: (i, 0)),
        ),
        compiler_params=pltpu.CompilerParams(
            dimension_semantics=("parallel",),
        ),
        cost_estimate=pl.CostEstimate(
            flops=flops, transcendentals=0, bytes_accessed=bytes_accessed
        ),
    )(x_in, w1, b1, w2, b2, w3, b3)

    # Row-slice off the padded (bias-only garbage) batch rows; columns are already exact.
    return out_padded if batch_p == batch else out_padded[:batch]


def init_params(key, input_size, hidden_sizes, output_size):
    """Deterministic synthetic init (uniform, PyTorch-Linear-like fan_in scaling)."""
    sizes = [input_size] + list(hidden_sizes) + [output_size]
    params = []
    for i in range(len(sizes) - 1):
        key, kw, kb = jax.random.split(key, 3)
        fan_in, fan_out = sizes[i], sizes[i + 1]
        bound = 1.0 / jnp.sqrt(fan_in)
        # stored transposed relative to PyTorch: (in, out)
        w = jax.random.uniform(kw, (fan_in, fan_out), jnp.float32, -bound, bound)
        b = jax.random.uniform(kb, (1, fan_out), jnp.float32, -bound, bound)
        params.append((w, b))
    return params


def reference_forward_f32(x, params):
    """Plain-JAX f32 reference of AgentModel.forward (eval mode)."""
    h = x
    for i, (w, b) in enumerate(params):
        h = h @ w + b
        if i < len(params) - 1:
            h = jnp.maximum(h, 0.0)
    return h


def reference_forward_bf16(x, params):
    """Plain-JAX reference mirroring the kernel's precision (bf16 operands, f32 accum)."""
    h = x.astype(jnp.bfloat16)
    for i, (w, b) in enumerate(params):
        h = jnp.dot(h, w.astype(jnp.bfloat16), preferred_element_type=jnp.float32)
        h = h + b.astype(jnp.float32)
        if i < len(params) - 1:
            h = jnp.maximum(h, 0.0).astype(jnp.bfloat16)
    return h


if __name__ == "__main__":
    # Shapes consistent with the module: input_size=32, hidden_sizes=[64, 32], output_size=16
    input_size, hidden_sizes, output_size = 32, [64, 32], 16

    key = jax.random.PRNGKey(0)
    key, kx1, kx2 = jax.random.split(key, 3)
    params = init_params(key, input_size, hidden_sizes, output_size)

    # Case 1: tiny batch (single grid step).
    x_small = jax.random.normal(kx1, (8, input_size), jnp.float32)
    out_small = jax.block_until_ready(agent_model_forward(x_small, params))
    assert out_small.shape == (8, output_size)
    ref_small = reference_forward_bf16(x_small, params)
    assert jnp.allclose(out_small, ref_small, atol=1e-3, rtol=1e-3), \
        "Pallas output mismatch vs bf16 reference (small batch)"
    assert jnp.allclose(out_small, reference_forward_f32(x_small, params), atol=5e-2, rtol=5e-2), \
        "Pallas output drifted too far from f32 reference (small batch)"

    # Case 2: multi-step grid (balanced tb, small row padding), exercising the pipelined
    # batch axis + megacore-friendly even split.
    x_big = jax.random.normal(kx2, (300, input_size), jnp.float32)
    out_big = jax.block_until_ready(agent_model_forward(x_big, params, batch_tile=128))
    assert out_big.shape == (300, output_size)
    ref_big = reference_forward_bf16(x_big, params)
    assert jnp.allclose(out_big, ref_big, atol=1e-3, rtol=1e-3), \
        "Pallas output mismatch vs bf16 reference (tiled batch)"

    print("KERNEL_OK")
</pallas_src>

<mosaic_0001>
module attributes {stable_mosaic.version = 11 : i64} {
  func.func @mlp_kernel(%arg0: i32, %arg1: memref<8x32xf32, #tpu.memory_space<vmem>>, %arg2: memref<32x128xbf16, #tpu.memory_space<vmem>>, %arg3: memref<1x128xf32, #tpu.memory_space<vmem>>, %arg4: memref<128x128xbf16, #tpu.memory_space<vmem>>, %arg5: memref<1x128xf32, #tpu.memory_space<vmem>>, %arg6: memref<128x16xbf16, #tpu.memory_space<vmem>>, %arg7: memref<1x16xf32, #tpu.memory_space<vmem>>, %arg8: memref<8x16xf32, #tpu.memory_space<vmem>>) attributes {dimension_semantics = [#tpu.dimension_semantics<parallel>], iteration_bounds = array<i64: 1>, scalar_prefetch = 0 : i64, scratch_operands = 0 : i64, tpu.core_type = #tpu.core_type<tc>, window_params = [{transform_indices = @transform_0, window_bounds = array<i64: 8, 32>}, {pipeline_mode = #tpu.pipeline_mode<synchronous>, transform_indices = @transform_1, window_bounds = array<i64: 32, 128>}, {pipeline_mode = #tpu.pipeline_mode<synchronous>, transform_indices = @transform_2, window_bounds = array<i64: 1, 128>}, {pipeline_mode = #tpu.pipeline_mode<synchronous>, transform_indices = @transform_3, window_bounds = array<i64: 128, 128>}, {pipeline_mode = #tpu.pipeline_mode<synchronous>, transform_indices = @transform_4, window_bounds = array<i64: 1, 128>}, {pipeline_mode = #tpu.pipeline_mode<synchronous>, transform_indices = @transform_5, window_bounds = array<i64: 128, 16>}, {pipeline_mode = #tpu.pipeline_mode<synchronous>, transform_indices = @transform_6, window_bounds = array<i64: 1, 16>}, {transform_indices = @transform_7, window_bounds = array<i64: 8, 16>}]} {
    %c0 = arith.constant 0 : index
    %c0_0 = arith.constant 0 : index
    %0 = vector.load %arg1[%c0, %c0_0] : memref<8x32xf32, #tpu.memory_space<vmem>>, vector<8x32xf32>
    %1 = arith.truncf %0 : vector<8x32xf32> to vector<8x32xbf16>
    %c0_1 = arith.constant 0 : index
    %c0_2 = arith.constant 0 : index
    %2 = vector.load %arg2[%c0_1, %c0_2] : memref<32x128xbf16, #tpu.memory_space<vmem>>, vector<32x128xbf16>
    %cst = arith.constant dense<0.000000e+00> : vector<8x128xf32>
    %3 = tpu.matmul %1, %2, %cst {dimension_numbers = #tpu.dot_dimension_numbers<[1], [0], [0], [1], [0, 0, 1, 1], [], []>} : vector<8x32xbf16>, vector<32x128xbf16>, vector<8x128xf32> -> vector<8x128xf32>
    %c0_3 = arith.constant 0 : index
    %c0_4 = arith.constant 0 : index
    %4 = vector.load %arg3[%c0_3, %c0_4] : memref<1x128xf32, #tpu.memory_space<vmem>>, vector<1x128xf32>
    %5 = vector.broadcast %4 : vector<1x128xf32> to vector<8x128xf32>
    %6 = arith.addf %3, %5 : vector<8x128xf32>
    %cst_5 = arith.constant 0.000000e+00 : f32
    %7 = vector.broadcast %cst_5 : f32 to vector<8x128xf32>
    %8 = arith.maximumf %6, %7 : vector<8x128xf32>
    %9 = arith.truncf %8 : vector<8x128xf32> to vector<8x128xbf16>
    %c0_6 = arith.constant 0 : index
    %c0_7 = arith.constant 0 : index
    %10 = vector.load %arg4[%c0_6, %c0_7] : memref<128x128xbf16, #tpu.memory_space<vmem>>, vector<128x128xbf16>
    %cst_8 = arith.constant dense<0.000000e+00> : vector<8x128xf32>
    %11 = tpu.matmul %9, %10, %cst_8 {dimension_numbers = #tpu.dot_dimension_numbers<[1], [0], [0], [1], [0, 0, 1, 1], [], []>} : vector<8x128xbf16>, vector<128x128xbf16>, vector<8x128xf32> -> vector<8x128xf32>
    %c0_9 = arith.constant 0 : index
    %c0_10 = arith.constant 0 : index
    %12 = vector.load %arg5[%c0_9, %c0_10] : memref<1x128xf32, #tpu.memory_space<vmem>>, vector<1x128xf32>
    %13 = vector.broadcast %12 : vector<1x128xf32> to vector<8x128xf32>
    %14 = arith.addf %11, %13 : vector<8x128xf32>
    %cst_11 = arith.constant 0.000000e+00 : f32
    %15 = vector.broadcast %cst_11 : f32 to vector<8x128xf32>
    %16 = arith.maximumf %14, %15 : vector<8x128xf32>
    %17 = arith.truncf %16 : vector<8x128xf32> to vector<8x128xbf16>
    %c0_12 = arith.constant 0 : index
    %c0_13 = arith.constant 0 : index
    %18 = vector.load %arg6[%c0_12, %c0_13] : memref<128x16xbf16, #tpu.memory_space<vmem>>, vector<128x16xbf16>
    %cst_14 = arith.constant dense<0.000000e+00> : vector<8x16xf32>
    %19 = tpu.matmul %17, %18, %cst_14 {dimension_numbers = #tpu.dot_dimension_numbers<[1], [0], [0], [1], [0, 0, 1, 1], [], []>} : vector<8x128xbf16>, vector<128x16xbf16>, vector<8x16xf32> -> vector<8x16xf32>
    %c0_15 = arith.constant 0 : index
    %c0_16 = arith.constant 0 : index
    %20 = vector.load %arg7[%c0_15, %c0_16] : memref<1x16xf32, #tpu.memory_space<vmem>>, vector<1x16xf32>
    %21 = vector.broadcast %20 : vector<1x16xf32> to vector<8x16xf32>
    %22 = arith.addf %19, %21 : vector<8x16xf32>
    %c0_17 = arith.constant 0 : index
    %c0_18 = arith.constant 0 : index
    %23 = vector.load %arg8[%c0_17, %c0_18] : memref<8x16xf32, #tpu.memory_space<vmem>>, vector<8x16xf32>
    tpu.vector_store %arg8[%c0_17, %c0_18], %22 {strides = array<i32>} : memref<8x16xf32, #tpu.memory_space<vmem>>, vector<8x16xf32>,
    return
  }
  func.func @transform_0(%arg0: i32) -> (i32, i32) {
    %c0_i32 = arith.constant 0 : i32
    %c0_i32_0 = arith.constant 0 : i32
    return %arg0, %c0_i32 : i32, i32
  }
  func.func @transform_1(%arg0: i32) -> (i32, i32) {
    %c0_i32 = arith.constant 0 : i32
    %c0_i32_0 = arith.constant 0 : i32
    %c0_i32_1 = arith.constant 0 : i32
    return %c0_i32, %c0_i32_0 : i32, i32
  }
  func.func @transform_2(%arg0: i32) -> (i32, i32) {
    %c0_i32 = arith.constant 0 : i32
    %c0_i32_0 = arith.constant 0 : i32
    %c0_i32_1 = arith.constant 0 : i32
    return %c0_i32, %c0_i32_0 : i32, i32
  }
  func.func @transform_3(%arg0: i32) -> (i32, i32) {
    %c0_i32 = arith.constant 0 : i32
    %c0_i32_0 = arith.constant 0 : i32
    %c0_i32_1 = arith.constant 0 : i32
    return %c0_i32, %c0_i32_0 : i32, i32
  }
  func.func @transform_4(%arg0: i32) -> (i32, i32) {
    %c0_i32 = arith.constant 0 : i32
    %c0_i32_0 = arith.constant 0 : i32
    %c0_i32_1 = arith.constant 0 : i32
    return %c0_i32, %c0_i32_0 : i32, i32
  }
  func.func @transform_5(%arg0: i32) -> (i32, i32) {
    %c0_i32 = arith.constant 0 : i32
    %c0_i32_0 = arith.constant 0 : i32
    %c0_i32_1 = arith.constant 0 : i32
    return %c0_i32, %c0_i32_0 : i32, i32
  }
  func.func @transform_6(%arg0: i32) -> (i32, i32) {
    %c0_i32 = arith.constant 0 : i32
    %c0_i32_0 = arith.constant 0 : i32
    %c0_i32_1 = arith.constant 0 : i32
    return %c0_i32, %c0_i32_0 : i32, i32
  }
  func.func @transform_7(%arg0: i32) -> (i32, i32) {
    %c0_i32 = arith.constant 0 : i32
    %c0_i32_0 = arith.constant 0 : i32
    return %arg0, %c0_i32 : i32, i32
  }
}

</mosaic_0001>

<bundles_post_ra>
// kernel: agent_model_forward.1
= control target key start
LH: loop header
LB: loop body
LE: loop exit
PB: predicated region body
PF: predicated region fallthrough
CT: control target
= control target key end

     0   :  { %s482_s0 = inlined_call_operand.vmem [shape: f32[8,32], index: 0, kind: input, shape index: {}]   ;;  %s483_s1 = inlined_call_operand.vmem [shape: bf16[32,128], index: 1, kind: input, shape index: {}]   ;;  %s484_s2 = inlined_call_operand.vmem [shape: f32[1,128], index: 2, kind: input, shape index: {}]   ;;  %s485_s3 = inlined_call_operand.vmem [shape: bf16[128,128], index: 3, kind: input, shape index: {}]   ;;  %s486_s4 = inlined_call_operand.vmem [shape: f32[1,128], index: 4, kind: input, shape index: {}]   ;;  %s487_s5 = inlined_call_operand.vmem [shape: bf16[128,16], index: 5, kind: input, shape index: {}]   ;;  %s488_s6 = inlined_call_operand.vmem [shape: f32[1,16], index: 6, kind: input, shape index: {}]   ;;  %s489_s7 = inlined_call_operand.hbm [shape: f32[8,16], index: 7, kind: output, shape index: {}]  }
   0x1   :  { %v325_v0 = vld [vmem:[%s483_s1 + $0x8] sm:$0xff]  ;;  %v333_v1 = vld [vmem:[%s485_s3 + $0x38] sm:$0xff]  ;;  %v324_v2 = vld [vmem:[%s483_s1] sm:$0xff] }
   0x2   :  { %60 = vmatpush.bf16.msra.mxu0 %v325_v0  ;;  %v28_v3 = vld [vmem:[%s482_s0] sm:$0xff]  ;;  %137 = vmatpush.bf16.msra.mxu1 %v333_v1  ;;  %v332_v4 = vld [vmem:[%s485_s3 + $0x30] sm:$0xff] }
   0x3   :  { %12 = vsyncpa [#allocation3], 0  ;;  %v29_v5 = vpack.c.bf16 %v28_v3, %v28_v3  ;;  %vm50_vm0 = vcmask 261120   ;;  %v331_v6 = vld [vmem:[%s485_s3 + $0x28] sm:$0xff]  ;;  %v330_v7 = vld [vmem:[%s485_s3 + $0x20] sm:$0xff]  ;;  %s372_s16 = smov [#allocation2]  }
   0x4   :  { %v329_v8 = vld [vmem:[%s485_s3 + $0x18] sm:$0xff]  ;;  %v328_v9 = vld [vmem:[%s485_s3 + $0x10] sm:$0xff]  ;;  %v327_v10 = vld [vmem:[%s485_s3 + $0x8] sm:$0xff]  ;;  %s240_s17 = sshll.u32 %s372_s16, 4  ;;  %vm233_vm1 = vcmask 130048   ;;  %s241_s17 = int_to_ptr.vmem [resolvable:$true] %s240_s17 }
   0x5   :  { %v326_v11 = vld [vmem:[%s485_s3] sm:$0xff]  ;;  %v341_v12 = vld [vmem:[%s487_s5 + $0x38] sm:$0xff]  ;;  %v340_v13 = vld [vmem:[%s487_s5 + $0x30] sm:$0xff] }
   0x6   :  { %61 = vmatpush.bf16.msra.mxu0 %v324_v2  ;;  %138 = vmatpush.bf16.msra.mxu1 %v332_v4  ;;  %v339_v14 = vld [vmem:[%s487_s5 + $0x28] sm:$0xff]  ;;  %v338_v15 = vld [vmem:[%s487_s5 + $0x20] sm:$0xff]  ;;  %v337_v16 = vld [vmem:[%s487_s5 + $0x18] sm:$0xff] }
   0x7   :  { %220 = vmatpush.bf16.msra.mxu2 %v341_v12  ;;  %v336_v17 = vld [vmem:[%s487_s5 + $0x10] sm:$0xff]  ;;  %v343_v18 = vld [vmem:[%s484_s2] ss:$0 sm:$0xff]  ;;  %v335_v24 = vld [vmem:[%s487_s5 + $0x8] sm:$0xff] }
   0x8   :  { %v334_v25 = vld [vmem:[%s487_s5] sm:$0xff]  ;;  %s242_s5 = sshll.u32 %s489_s7, 4  ;;  %s243_s5 = int_to_ptr.hbm [resolvable:$true] %s242_s5 }
   0x9   :  { %259 = vmatmul.msk.bf16.vlgmr.msra.gmra.mxu0 %vm50_vm0, %v29_v5  ;;  %v344_v26 = vld [vmem:[%s486_s4] ss:$0 sm:$0xff] }
   0xa   :  { %139 = vmatpush.bf16.msra.mxu1 %v331_v6  ;;  %v345_v32 = vld [vmem:[%s488_s6] ss:$0 sm:$0xff] }
   0xb   :  { %221 = vmatpush.bf16.msra.mxu2 %v340_v13 }
   0xe   :  { %140 = vmatpush.bf16.msra.mxu1 %v330_v7 }
   0xf   :  { %222 = vmatpush.bf16.msra.mxu2 %v339_v14 }
  0x12   :  { %141 = vmatpush.bf16.msra.mxu1 %v329_v8 }
  0x13   :  { %223 = vmatpush.bf16.msra.mxu2 %v338_v15 }
  0x16   :  { %142 = vmatpush.bf16.msra.mxu1 %v328_v9 }
  0x17   :  { %224 = vmatpush.bf16.msra.mxu2 %v337_v16 }
  0x1a   :  { %143 = vmatpush.bf16.msra.mxu1 %v327_v10 }
  0x1b   :  { %225 = vmatpush.bf16.msra.mxu2 %v336_v17 }
  0x1e   :  { %144 = vmatpush.bf16.msra.mxu1 %v326_v11 }
  0x1f   :  { %226 = vmatpush.bf16.msra.mxu2 %v335_v24 }
  0x23   :  { %227 = vmatpush.bf16.msra.mxu2 %v334_v25 }
  0x86   :  { %v63_v19 = vpop.f32.mrf.mxu0 }
  0x87   :  { %v64_v20 = vadd.f32 %v343_v18, %v63_v19 }
  0x89   :  { %v67_v21 = vmax.f32 %v64_v20, 0.0 }
  0x8b   :  { %v68_v22 = vpack.c.bf16 %v67_v21, %v67_v21 }
  0x8d   :  { %145 = vmatmul.bf16.vlgmr.msra.gmra.mxu1 %v68_v22 }
  0x8e   :  { %v65_v23 = vpop.f32.mrf.mxu0 }
 0x10a   :  { %v146_v27 = vpop.f32.mrf.mxu1 }
 0x10b   :  { %v147_v28 = vadd.f32 %v344_v26, %v146_v27 }
 0x10d   :  { %v150_v29 = vmax.f32 %v147_v28, 0.0 }
 0x10f   :  { %v151_v30 = vpack.c.bf16 %v150_v29, %v150_v29 }
 0x111   :  { %228 = vmatmul.bf16.vlgmr.msra.gmra.mxu2 %v151_v30 }
 0x112   :  { %v148_v31 = vpop.f32.mrf.mxu1 }
 0x194   :  { %v229_v33 = vpop.f32.mrf.mxu2 }
 0x195   :  { %v230_v34 = vadd.f32 %v345_v32, %v229_v33 }
 0x197   :  { %234 = vst.msk [vmem:[#allocation2] sm:$0xff] %vm233_vm1, %v230_v34 }
 0x198   :  { %245 = dma.vmem_to_hbm [thread:$0]  %s241_s17, 128, %s243_s5, [#allocation3]  }
 0x19c   :  { %v231_v35 = vpop.f32.mrf.mxu2 }
 0x19d   :  { %370 = dma.done.wait [#allocation3], 128  }
 0x19e   :  { %371 = vsyncadd [#allocation3], 4294967168 }
 0x19f   :  { %250 = vsyncpa [#allocation3], 1 }

</bundles_post_ra>
